<compile_context>
chip_gen: v5e
topology: v5e:2x2
jax: 0.10.0
libtpu: 0.0.40
codegen_flags: <defaults>
</compile_context>

<pallas_src>
import functools
import math

import jax
import jax.numpy as jnp
import numpy as np
from jax.experimental import pallas as pl
from jax.experimental.pallas import tpu as pltpu

EPS = 1e-5
LANES = 128


# ------------------------------ Pallas kernels ------------------------------

def _conv3x3_fused_kernel(x_ref, w_ref, scale_ref, shift_ref,
                          y_ref, s_ref, sq_ref, *,
                          rows_per_image, relu_prologue):
    """3x3 conv (pad=1) + fused BN batch-stats over a block of Bt images.

    x_ref:     (Bt, H, W*Cin)       f32 packed images (W, C share the lane dim)
    w_ref:     (3, W*Cin, W*Coutp)  bf16 banded block weights, one per kh
                                    (kw taps + W zero padding folded in;
                                     Coutp padded so W*Coutp % 128 == 0)
    scale_ref: (1, W*Cin) f32       producer BN scale (used iff relu_prologue)
    shift_ref: (1, W*Cin) f32       producer BN shift (used iff relu_prologue)
    y_ref:     (Bt, H, W*Coutp) f32 raw conv output (pre-BN), lane-dense
    s_ref:     (1, 1, W*Coutp)  f32 per-step partial sum   (per (w, o) column)
    sq_ref:    (1, 1, W*Coutp)  f32 per-step partial sum of squares
    """
    bt, ho, wci = x_ref.shape
    m = bt * ho
    n = w_ref.shape[2]

    x = x_ref[...].reshape(m, wci)
    if relu_prologue:
        # Fused BN+ReLU of the previous conv (f32 VPU math), applied before
        # the implicit zero padding, exactly as torch pads the activations.
        x = jnp.maximum(x * scale_ref[...] + shift_ref[...], 0.0)

    # bf16 MXU operands, f32 accumulation.
    xb = x.astype(jnp.bfloat16)
    p0 = jnp.dot(xb, w_ref[0], preferred_element_type=jnp.float32)
    p1 = jnp.dot(xb, w_ref[1], preferred_element_type=jnp.float32)
    p2 = jnp.dot(xb, w_ref[2], preferred_element_type=jnp.float32)

    # kh taps: out[h] = p0[h-1] + p1[h] + p2[h+1] with zeros at image borders.
    # XLU sublane rolls (free slot) + per-image border masks; the masks also
    # kill cross-image leakage when Bt > 1 images share the M dimension.
    r = jax.lax.broadcasted_iota(jnp.int32, (m, 1), 0) % rows_per_image
    acc = p1
    acc = acc + jnp.where(r == 0, 0.0, pltpu.roll(p0, 1, axis=0))
    acc = acc + jnp.where(r == rows_per_image - 1, 0.0,
                          pltpu.roll(p2, m - 1, axis=0))

    y_ref[...] = acc.reshape(bt, ho, n)
    s_ref[0] = jnp.sum(acc, axis=0, keepdims=True)
    sq_ref[0] = jnp.sum(acc * acc, axis=0, keepdims=True)


def _scale_shift_relu_kernel(x_ref, scale_ref, shift_ref, o_ref):
    o_ref[...] = jnp.maximum(x_ref[...] * scale_ref[...] + shift_ref[...], 0.0)


# ------------------------------ Pallas wrappers ------------------------------

def _pick_bt(b, ho, target_rows=256):
    """Images per grid step: fill the MXU M dim but keep >= 2 steps (megacore)."""
    bt = max(1, min(b, max(1, target_rows // max(ho, 1))))
    while bt > 1 and (b % bt != 0 or b // bt < 2):
        bt -= 1
    return bt


def _pick_row_tile(m):
    """Largest tile (multiple of 8) dividing m with >= 2 grid steps, else m."""
    for rt in (512, 256, 128, 64, 32, 16, 8):
        if rt < m and m % rt == 0:
            return rt
    return m


def conv3x3_fused(x_packed, w_band, scale_t, shift_t, bt, relu_prologue):
    """Packed 3x3 conv + fused batch-stats. Returns (y, sum, sumsq)."""
    b, ho, wci = x_packed.shape
    n = w_band.shape[2]
    steps = b // bt
    kernel = functools.partial(_conv3x3_fused_kernel,
                               rows_per_image=ho,
                               relu_prologue=relu_prologue)
    return pl.pallas_call(
        kernel,
        out_shape=(
            jax.ShapeDtypeStruct((b, ho, n), jnp.float32),
            jax.ShapeDtypeStruct((steps, 1, n), jnp.float32),
            jax.ShapeDtypeStruct((steps, 1, n), jnp.float32),
        ),
        grid_spec=pltpu.PrefetchScalarGridSpec(
            num_scalar_prefetch=0,
            grid=(steps,),
            in_specs=[
                pl.BlockSpec((bt, ho, wci), lambda i: (i, 0, 0)),
                pl.BlockSpec(w_band.shape, lambda i: (0, 0, 0)),
                pl.BlockSpec((1, wci), lambda i: (0, 0)),
                pl.BlockSpec((1, wci), lambda i: (0, 0)),
            ],
            out_specs=(
                pl.BlockSpec((bt, ho, n), lambda i: (i, 0, 0)),
                pl.BlockSpec((1, 1, n), lambda i: (i, 0, 0)),
                pl.BlockSpec((1, 1, n), lambda i: (i, 0, 0)),
            ),
        ),
        compiler_params=pltpu.CompilerParams(
            dimension_semantics=("parallel",),
            # Blocks are sized for every chip's scoped VMEM (v7x: 64 MiB
            # physical / 32 MiB default scoped; v5e default is 16 MiB).
            vmem_limit_bytes=32 * 1024 * 1024,
        ),
    )(x_packed, w_band, scale_t, shift_t)


def scale_shift_relu(x2d, scale_t, shift_t):
    """Row-tiled lane-dense y = max(x*scale + shift, 0) on (M, N)."""
    m, n = x2d.shape
    rt = _pick_row_tile(m)
    return pl.pallas_call(
        _scale_shift_relu_kernel,
        out_shape=jax.ShapeDtypeStruct((m, n), jnp.float32),
        grid_spec=pltpu.PrefetchScalarGridSpec(
            num_scalar_prefetch=0,
            grid=(m // rt,),
            in_specs=[
                pl.BlockSpec((rt, n), lambda i: (i, 0)),
                pl.BlockSpec((1, n), lambda i: (0, 0)),
                pl.BlockSpec((1, n), lambda i: (0, 0)),
            ],
            out_specs=pl.BlockSpec((rt, n), lambda i: (i, 0)),
        ),
        compiler_params=pltpu.CompilerParams(
            dimension_semantics=("parallel",)),
    )(x2d, scale_t, shift_t)


# --------------------------------- model glue --------------------------------

def _pad_channels(cout, wo):
    """Smallest padded channel count so wo*cout_p is a multiple of 128 lanes."""
    step = LANES // math.gcd(wo, LANES)
    return ((cout + step - 1) // step) * step


def _band_conv_weights(w, wo, cin_pad, cout_pad):
    """torch Conv2d weight (O, C, 3, 3) -> bf16 (3, wo*cin_pad, wo*cout_pad).

    band_kh[w_in*Cp + c, w_out*Op + o] = w[o, c, kh, w_in - w_out + 1]
    for |w_in - w_out| <= 1 (and c < C, o < O), else 0.  Right-multiplying a
    packed row block (M, wo*Cp) by band_kh applies all three kw taps *and*
    the W zero padding in one lane-dense matmul; padded channel slots carry
    zero weights.
    """
    o_ch, c_ch = w.shape[0], w.shape[1]
    mats = []
    for kh in range(3):
        m = jnp.zeros((wo * cin_pad, wo * cout_pad), jnp.float32)
        for kw in range(3):
            tap = jnp.zeros((cin_pad, cout_pad), jnp.float32)
            tap = tap.at[:c_ch, :o_ch].set(
                jnp.transpose(w[:, :, kh, kw]).astype(jnp.float32))
            shift = jnp.eye(wo, wo, k=1 - kw, dtype=jnp.float32)
            m = m + jnp.kron(shift, tap)
        mats.append(m)
    return jnp.stack(mats, axis=0).astype(jnp.bfloat16)


def _bn_affine_packed(s, sq, count, wo, cp, cout, gamma, beta):
    """Per-channel batch mean/var from packed partial sums -> packed scale/shift."""
    tot = jnp.sum(s, axis=(0, 1)).reshape(wo, cp)[:, :cout].sum(axis=0)
    tot_sq = jnp.sum(sq, axis=(0, 1)).reshape(wo, cp)[:, :cout].sum(axis=0)
    mean = tot / count
    var = jnp.maximum(tot_sq / count - mean * mean, 0.0)   # cancellation guard
    scale = gamma * jax.lax.rsqrt(var + EPS)
    shift = beta - mean * scale
    scale_p = jnp.zeros((cp,), jnp.float32).at[:cout].set(scale)
    shift_p = jnp.zeros((cp,), jnp.float32).at[:cout].set(shift)
    return (jnp.tile(scale_p, wo).reshape(1, wo * cp),
            jnp.tile(shift_p, wo).reshape(1, wo * cp))


@jax.jit
def up_forward(x_nchw, prex_nchw, params):
    b, cx, h, w = x_nchw.shape
    out_ch = params["w_up"].shape[1]
    in_ch = params["w1"].shape[1]
    ho, wo = 2 * h, 2 * w
    count = b * ho * wo
    cp = _pad_channels(out_ch, wo)          # lane-padded conv output channels

    # --- ConvTranspose2d(2x2, stride 2) + concat + lane packing: plain XLA
    #     glue so the tiny matmul fuses with the pixel-shuffle/concat (the
    #     previous Pallas call was a fusion barrier with a 16-lane output).
    x_nhwc = jnp.transpose(x_nchw, (0, 2, 3, 1))
    w_up = jnp.transpose(params["w_up"], (0, 2, 3, 1)).reshape(cx, 4 * out_ch)
    y = (x_nhwc.reshape(b * h * w, cx) @ w_up).reshape(b, h, w, 2, 2, out_ch)
    y = y + params["b_up"]
    y = y.transpose(0, 1, 3, 2, 4, 5).reshape(b, ho, wo, out_ch)
    prex = jnp.transpose(prex_nchw, (0, 2, 3, 1))
    cat = jnp.concatenate([y, prex], axis=-1)               # (B, Ho, Wo, in_ch)
    cat_p = cat.reshape(b, ho, wo * in_ch).astype(jnp.float32)

    bt = _pick_bt(b, ho)

    # --- conv1 + fused batch stats (conv bias dropped: cancelled by train BN).
    w1_band = _band_conv_weights(params["w1"], wo, in_ch, cp)
    dummy = jnp.zeros((1, wo * in_ch), jnp.float32)
    y1, s1, sq1 = conv3x3_fused(cat_p, w1_band, dummy, dummy, bt,
                                relu_prologue=False)
    scale1_t, shift1_t = _bn_affine_packed(s1, sq1, count, wo, cp, out_ch,
                                           params["g1"], params["be1"])

    # --- conv2 with BN1+ReLU fused as prologue, + fused batch stats.
    w2_band = _band_conv_weights(params["w2"], wo, cp, cp)
    y2, s2, sq2 = conv3x3_fused(y1, w2_band, scale1_t, shift1_t, bt,
                                relu_prologue=True)
    scale2_t, shift2_t = _bn_affine_packed(s2, sq2, count, wo, cp, out_ch,
                                           params["g2"], params["be2"])

    # --- final BN2 + ReLU: row-tiled, lane-dense elementwise pass.
    out_p = scale_shift_relu(y2.reshape(b * ho, wo * cp), scale2_t, shift2_t)
    out = out_p.reshape(b, ho, wo, cp)[..., :out_ch]
    return jnp.transpose(out, (0, 3, 1, 2))                 # NCHW


# ----------------------------- pure-JAX reference -----------------------------

def _ref_conv3x3(x_nhwc, w, b):
    bsz, h, wd, c = x_nhwc.shape
    xp = jnp.pad(x_nhwc, ((0, 0), (1, 1), (1, 1), (0, 0)))
    out = jnp.zeros((bsz, h, wd, w.shape[0]), jnp.float32)
    for kh in range(3):
        for kw in range(3):
            out = out + jnp.einsum("nhwc,oc->nhwo",
                                   xp[:, kh:kh + h, kw:kw + wd, :],
                                   w[:, :, kh, kw])
    return out + b


def _ref_bn_relu(x_nhwc, gamma, beta):
    mean = jnp.mean(x_nhwc, axis=(0, 1, 2))
    var = jnp.var(x_nhwc, axis=(0, 1, 2))
    y = (x_nhwc - mean) / jnp.sqrt(var + EPS) * gamma + beta
    return jnp.maximum(y, 0.0)


def ref_forward(x_nchw, prex_nchw, p):
    b, cin, h, w = x_nchw.shape
    out_ch = p["w_up"].shape[1]
    x = jnp.transpose(x_nchw, (0, 2, 3, 1))
    t = jnp.einsum("nijc,codk->nidjko", x, p["w_up"])
    y = t.reshape(b, 2 * h, 2 * w, out_ch) + p["b_up"]
    cat = jnp.concatenate([y, jnp.transpose(prex_nchw, (0, 2, 3, 1))], axis=-1)
    hdn = _ref_bn_relu(_ref_conv3x3(cat, p["w1"], p["b1"]), p["g1"], p["be1"])
    hdn = _ref_bn_relu(_ref_conv3x3(hdn, p["w2"], p["b2"]), p["g2"], p["be2"])
    return jnp.transpose(hdn, (0, 3, 1, 2))


# ------------------------------------ main ------------------------------------

if __name__ == "__main__":
    in_ch, out_ch = 8, 4
    B, H, W = 2, 8, 8          # x spatial; prex / output spatial = 2H x 2W

    key = jax.random.PRNGKey(0)
    ks = jax.random.split(key, 12)
    f32 = jnp.float32
    params = {
        # ConvTranspose2d(in_ch, out_ch, 2, stride=2): weight (in_ch, out_ch, 2, 2)
        "w_up": (0.1 * jax.random.normal(ks[0], (in_ch, out_ch, 2, 2))).astype(f32),
        "b_up": (0.1 * jax.random.normal(ks[1], (out_ch,))).astype(f32),
        # double_conv: Conv2d(in_ch, out_ch, 3, pad=1)+BN, Conv2d(out_ch, out_ch, 3, pad=1)+BN
        "w1": (0.1 * jax.random.normal(ks[2], (out_ch, in_ch, 3, 3))).astype(f32),
        "b1": (0.1 * jax.random.normal(ks[3], (out_ch,))).astype(f32),
        "g1": (1.0 + 0.1 * jax.random.normal(ks[4], (out_ch,))).astype(f32),
        "be1": (0.1 * jax.random.normal(ks[5], (out_ch,))).astype(f32),
        "w2": (0.1 * jax.random.normal(ks[6], (out_ch, out_ch, 3, 3))).astype(f32),
        "b2": (0.1 * jax.random.normal(ks[7], (out_ch,))).astype(f32),
        "g2": (1.0 + 0.1 * jax.random.normal(ks[8], (out_ch,))).astype(f32),
        "be2": (0.1 * jax.random.normal(ks[9], (out_ch,))).astype(f32),
    }

    x = jax.random.normal(ks[10], (B, in_ch, H, W), dtype=f32)
    prex = jax.random.normal(ks[11], (B, in_ch - out_ch, 2 * H, 2 * W), dtype=f32)

    out = jax.block_until_ready(up_forward(x, prex, params))
    assert out.shape == (B, out_ch, 2 * H, 2 * W), out.shape

    ref = jax.block_until_ready(ref_forward(x, prex, params))
    # Tolerance sized for bf16 MXU operands (f32 accumulation / f32 BN math).
    np.testing.assert_allclose(np.asarray(out), np.asarray(ref),
                               rtol=3e-2, atol=3e-2)

    print("KERNEL_OK")
</pallas_src>

<mosaic_0001>
module attributes {stable_mosaic.version = 11 : i64} {
  func.func @_conv3x3_fused_kernel(%arg0: i32, %arg1: memref<1x16x128xf32, #tpu.memory_space<vmem>>, %arg2: memref<3x128x128xbf16, #tpu.memory_space<vmem>>, %arg3: memref<1x128xf32, #tpu.memory_space<vmem>>, %arg4: memref<1x128xf32, #tpu.memory_space<vmem>>, %arg5: memref<1x16x128xf32, #tpu.memory_space<vmem>>, %arg6: memref<1x1x128xf32, #tpu.memory_space<vmem>>, %arg7: memref<1x1x128xf32, #tpu.memory_space<vmem>>) attributes {dimension_semantics = [#tpu.dimension_semantics<parallel>], iteration_bounds = array<i64: 2>, scalar_prefetch = 0 : i64, scratch_operands = 0 : i64, tpu.core_type = #tpu.core_type<tc>, window_params = [{transform_indices = @transform_0, window_bounds = array<i64: 1, 16, 128>}, {pipeline_mode = #tpu.pipeline_mode<synchronous>, transform_indices = @transform_1, window_bounds = array<i64: 3, 128, 128>}, {pipeline_mode = #tpu.pipeline_mode<synchronous>, transform_indices = @transform_2, window_bounds = array<i64: 1, 128>}, {pipeline_mode = #tpu.pipeline_mode<synchronous>, transform_indices = @transform_3, window_bounds = array<i64: 1, 128>}, {transform_indices = @transform_4, window_bounds = array<i64: 1, 16, 128>}, {transform_indices = @transform_5, window_bounds = array<i64: 1, 1, 128>}, {transform_indices = @transform_6, window_bounds = array<i64: 1, 1, 128>}]} {
    %c0 = arith.constant 0 : index
    %c0_0 = arith.constant 0 : index
    %c0_1 = arith.constant 0 : index
    %0 = vector.load %arg1[%c0, %c0_0, %c0_1] : memref<1x16x128xf32, #tpu.memory_space<vmem>>, vector<1x16x128xf32>
    %1 = vector.shape_cast %0 : vector<1x16x128xf32> to vector<16x128xf32>
    %2 = arith.truncf %1 : vector<16x128xf32> to vector<16x128xbf16>
    %c0_2 = arith.constant 0 : index
    %c0_3 = arith.constant 0 : index
    %c0_4 = arith.constant 0 : index
    %3 = vector.load %arg2[%c0_2, %c0_3, %c0_4] : memref<3x128x128xbf16, #tpu.memory_space<vmem>>, vector<1x128x128xbf16>
    %4 = vector.shape_cast %3 : vector<1x128x128xbf16> to vector<128x128xbf16>
    %cst = arith.constant dense<0.000000e+00> : vector<16x128xf32>
    %5 = tpu.matmul %2, %4, %cst {dimension_numbers = #tpu.dot_dimension_numbers<[1], [0], [0], [1], [0, 0, 1, 1], [], []>} : vector<16x128xbf16>, vector<128x128xbf16>, vector<16x128xf32> -> vector<16x128xf32>
    %c1 = arith.constant 1 : index
    %c0_5 = arith.constant 0 : index
    %c0_6 = arith.constant 0 : index
    %6 = vector.load %arg2[%c1, %c0_5, %c0_6] : memref<3x128x128xbf16, #tpu.memory_space<vmem>>, vector<1x128x128xbf16>
    %7 = vector.shape_cast %6 : vector<1x128x128xbf16> to vector<128x128xbf16>
    %cst_7 = arith.constant dense<0.000000e+00> : vector<16x128xf32>
    %8 = tpu.matmul %2, %7, %cst_7 {dimension_numbers = #tpu.dot_dimension_numbers<[1], [0], [0], [1], [0, 0, 1, 1], [], []>} : vector<16x128xbf16>, vector<128x128xbf16>, vector<16x128xf32> -> vector<16x128xf32>
    %c2 = arith.constant 2 : index
    %c0_8 = arith.constant 0 : index
    %c0_9 = arith.constant 0 : index
    %9 = vector.load %arg2[%c2, %c0_8, %c0_9] : memref<3x128x128xbf16, #tpu.memory_space<vmem>>, vector<1x128x128xbf16>
    %10 = vector.shape_cast %9 : vector<1x128x128xbf16> to vector<128x128xbf16>
    %cst_10 = arith.constant dense<0.000000e+00> : vector<16x128xf32>
    %11 = tpu.matmul %2, %10, %cst_10 {dimension_numbers = #tpu.dot_dimension_numbers<[1], [0], [0], [1], [0, 0, 1, 1], [], []>} : vector<16x128xbf16>, vector<128x128xbf16>, vector<16x128xf32> -> vector<16x128xf32>
    %12 = tpu.iota {dimensions = array<i32: 0>} : vector<16x1xi32>
    %c16_i32 = arith.constant 16 : i32
    %c0_i32 = arith.constant 0 : i32
    %13 = arith.cmpi eq, %c16_i32, %c0_i32 : i32
    %c1_i32 = arith.constant 1 : i32
    %14 = arith.select %13, %c1_i32, %c16_i32 : i32
    %15 = vector.broadcast %14 : i32 to vector<16x1xi32>
    %16 = arith.remsi %12, %15 : vector<16x1xi32>
    %c0_i32_11 = arith.constant 0 : i32
    %17 = vector.broadcast %c0_i32_11 : i32 to vector<16x1xi32>
    %18 = arith.cmpi ne, %16, %17 : vector<16x1xi32>
    %c0_i32_12 = arith.constant 0 : i32
    %19 = vector.broadcast %c0_i32_12 : i32 to vector<16x1xi32>
    %20 = arith.cmpi slt, %16, %19 : vector<16x1xi32>
    %c0_i32_13 = arith.constant 0 : i32
    %21 = arith.cmpi slt, %14, %c0_i32_13 : i32
    %22 = vector.broadcast %21 : i1 to vector<16x1xi1>
    %23 = vector.broadcast %22 : vector<16x1xi1> to vector<16x1xi1>
    %24 = arith.xori %20, %23 : vector<16x1xi1>
    %25 = arith.andi %24, %18 : vector<16x1xi1>
    %26 = vector.broadcast %14 : i32 to vector<16x1xi32>
    %27 = arith.addi %16, %26 : vector<16x1xi32>
    %28 = arith.select %25, %27, %16 : vector<16x1xi1>, vector<16x1xi32>
    %c0_i32_14 = arith.constant 0 : i32
    %29 = vector.broadcast %c0_i32_14 : i32 to vector<16x1xi32>
    %30 = arith.cmpi eq, %28, %29 : vector<16x1xi32>
    %c1_i32_15 = arith.constant 1 : i32
    %31 = tpu.dynamic_rotate %5 by %c1_i32_15 dim 0 : vector<16x128xf32>, i32 -> vector<16x128xf32>
    %cst_16 = arith.constant 0.000000e+00 : f32
    %32 = vector.shape_cast %30 : vector<16x1xi1> to vector<16x1xi1>
    %33 = vector.broadcast %32 : vector<16x1xi1> to vector<16x128xi1>
    %34 = vector.broadcast %cst_16 : f32 to vector<16x128xf32>
    %35 = arith.select %33, %34, %31 : vector<16x128xi1>, vector<16x128xf32>
    %36 = arith.addf %8, %35 : vector<16x128xf32>
    %c15_i32 = arith.constant 15 : i32
    %37 = vector.broadcast %c15_i32 : i32 to vector<16x1xi32>
    %38 = arith.cmpi eq, %28, %37 : vector<16x1xi32>
    %c15_i32_17 = arith.constant 15 : i32
    %39 = tpu.dynamic_rotate %11 by %c15_i32_17 dim 0 : vector<16x128xf32>, i32 -> vector<16x128xf32>
    %cst_18 = arith.constant 0.000000e+00 : f32
    %40 = vector.shape_cast %38 : vector<16x1xi1> to vector<16x1xi1>
    %41 = vector.broadcast %40 : vector<16x1xi1> to vector<16x128xi1>
    %42 = vector.broadcast %cst_18 : f32 to vector<16x128xf32>
    %43 = arith.select %41, %42, %39 : vector<16x128xi1>, vector<16x128xf32>
    %44 = arith.addf %36, %43 : vector<16x128xf32>
    %45 = vector.shape_cast %44 : vector<16x128xf32> to vector<1x16x128xf32>
    %c0_19 = arith.constant 0 : index
    %c0_20 = arith.constant 0 : index
    %c0_21 = arith.constant 0 : index
    %46 = vector.load %arg5[%c0_19, %c0_20, %c0_21] : memref<1x16x128xf32, #tpu.memory_space<vmem>>, vector<1x16x128xf32>
    tpu.vector_store %arg5[%c0_19, %c0_20, %c0_21], %45 {strides = array<i32>} : memref<1x16x128xf32, #tpu.memory_space<vmem>>, vector<1x16x128xf32>,
    %cst_22 = arith.constant dense<0.000000e+00> : vector<128xf32>
    %47 = vector.multi_reduction <add>, %44, %cst_22 [0] : vector<16x128xf32> to vector<128xf32>
    %48 = vector.shape_cast %47 : vector<128xf32> to vector<1x128xf32>
    %c0_23 = arith.constant 0 : index
    %c0_24 = arith.constant 0 : index
    %c0_25 = arith.constant 0 : index
    %49 = vector.load %arg6[%c0_23, %c0_24, %c0_25] : memref<1x1x128xf32, #tpu.memory_space<vmem>>, vector<1x1x128xf32>
    %50 = vector.shape_cast %49 : vector<1x1x128xf32> to vector<1x128xf32>
    %51 = vector.shape_cast %48 : vector<1x128xf32> to vector<1x1x128xf32>
    tpu.vector_store %arg6[%c0_23, %c0_24, %c0_25], %51 {strides = array<i32>} : memref<1x1x128xf32, #tpu.memory_space<vmem>>, vector<1x1x128xf32>,
    %52 = arith.mulf %44, %44 : vector<16x128xf32>
    %cst_26 = arith.constant dense<0.000000e+00> : vector<128xf32>
    %53 = vector.multi_reduction <add>, %52, %cst_26 [0] : vector<16x128xf32> to vector<128xf32>
    %54 = vector.shape_cast %53 : vector<128xf32> to vector<1x128xf32>
    %c0_27 = arith.constant 0 : index
    %c0_28 = arith.constant 0 : index
    %c0_29 = arith.constant 0 : index
    %55 = vector.load %arg7[%c0_27, %c0_28, %c0_29] : memref<1x1x128xf32, #tpu.memory_space<vmem>>, vector<1x1x128xf32>
    %56 = vector.shape_cast %55 : vector<1x1x128xf32> to vector<1x128xf32>
    %57 = vector.shape_cast %54 : vector<1x128xf32> to vector<1x1x128xf32>
    tpu.vector_store %arg7[%c0_27, %c0_28, %c0_29], %57 {strides = array<i32>} : memref<1x1x128xf32, #tpu.memory_space<vmem>>, vector<1x1x128xf32>,
    return
  }
  func.func @transform_0(%arg0: i32) -> (i32, i32, i32) {
    %c0_i32 = arith.constant 0 : i32
    %c0_i32_0 = arith.constant 0 : i32
    %c0_i32_1 = arith.constant 0 : i32
    return %arg0, %c0_i32, %c0_i32_0 : i32, i32, i32
  }
  func.func @transform_1(%arg0: i32) -> (i32, i32, i32) {
    %c0_i32 = arith.constant 0 : i32
    %c0_i32_0 = arith.constant 0 : i32
    %c0_i32_1 = arith.constant 0 : i32
    %c0_i32_2 = arith.constant 0 : i32
    return %c0_i32, %c0_i32_0, %c0_i32_1 : i32, i32, i32
  }
  func.func @transform_2(%arg0: i32) -> (i32, i32) {
    %c0_i32 = arith.constant 0 : i32
    %c0_i32_0 = arith.constant 0 : i32
    %c0_i32_1 = arith.constant 0 : i32
    return %c0_i32, %c0_i32_0 : i32, i32
  }
  func.func @transform_3(%arg0: i32) -> (i32, i32) {
    %c0_i32 = arith.constant 0 : i32
    %c0_i32_0 = arith.constant 0 : i32
    %c0_i32_1 = arith.constant 0 : i32
    return %c0_i32, %c0_i32_0 : i32, i32
  }
  func.func @transform_4(%arg0: i32) -> (i32, i32, i32) {
    %c0_i32 = arith.constant 0 : i32
    %c0_i32_0 = arith.constant 0 : i32
    %c0_i32_1 = arith.constant 0 : i32
    return %arg0, %c0_i32, %c0_i32_0 : i32, i32, i32
  }
  func.func @transform_5(%arg0: i32) -> (i32, i32, i32) {
    %c0_i32 = arith.constant 0 : i32
    %c0_i32_0 = arith.constant 0 : i32
    %c0_i32_1 = arith.constant 0 : i32
    return %arg0, %c0_i32, %c0_i32_0 : i32, i32, i32
  }
  func.func @transform_6(%arg0: i32) -> (i32, i32, i32) {
    %c0_i32 = arith.constant 0 : i32
    %c0_i32_0 = arith.constant 0 : i32
    %c0_i32_1 = arith.constant 0 : i32
    return %arg0, %c0_i32, %c0_i32_0 : i32, i32, i32
  }
}

module attributes {stable_mosaic.version = 11 : i64} {
  func.func @_conv3x3_fused_kernel(%arg0: i32, %arg1: memref<1x16x128xf32, #tpu.memory_space<vmem>>, %arg2: memref<3x128x128xbf16, #tpu.memory_space<vmem>>, %arg3: memref<1x128xf32, #tpu.memory_space<vmem>>, %arg4: memref<1x128xf32, #tpu.memory_space<vmem>>, %arg5: memref<1x16x128xf32, #tpu.memory_space<vmem>>, %arg6: memref<1x1x128xf32, #tpu.memory_space<vmem>>, %arg7: memref<1x1x128xf32, #tpu.memory_space<vmem>>) attributes {dimension_semantics = [#tpu.dimension_semantics<parallel>], iteration_bounds = array<i64: 2>, scalar_prefetch = 0 : i64, scratch_operands = 0 : i64, tpu.core_type = #tpu.core_type<tc>, window_params = [{transform_indices = @transform_0, window_bounds = array<i64: 1, 16, 128>}, {pipeline_mode = #tpu.pipeline_mode<synchronous>, transform_indices = @transform_1, window_bounds = array<i64: 3, 128, 128>}, {pipeline_mode = #tpu.pipeline_mode<synchronous>, transform_indices = @transform_2, window_bounds = array<i64: 1, 128>}, {pipeline_mode = #tpu.pipeline_mode<synchronous>, transform_indices = @transform_3, window_bounds = array<i64: 1, 128>}, {transform_indices = @transform_4, window_bounds = array<i64: 1, 16, 128>}, {transform_indices = @transform_5, window_bounds = array<i64: 1, 1, 128>}, {transform_indices = @transform_6, window_bounds = array<i64: 1, 1, 128>}]} {
    %c0 = arith.constant 0 : index
    %c0_0 = arith.constant 0 : index
    %c0_1 = arith.constant 0 : index
    %0 = vector.load %arg1[%c0, %c0_0, %c0_1] : memref<1x16x128xf32, #tpu.memory_space<vmem>>, vector<1x16x128xf32>
    %1 = vector.shape_cast %0 : vector<1x16x128xf32> to vector<16x128xf32>
    %c0_2 = arith.constant 0 : index
    %c0_3 = arith.constant 0 : index
    %2 = vector.load %arg3[%c0_2, %c0_3] : memref<1x128xf32, #tpu.memory_space<vmem>>, vector<1x128xf32>
    %3 = vector.broadcast %2 : vector<1x128xf32> to vector<16x128xf32>
    %4 = arith.mulf %1, %3 : vector<16x128xf32>
    %c0_4 = arith.constant 0 : index
    %c0_5 = arith.constant 0 : index
    %5 = vector.load %arg4[%c0_4, %c0_5] : memref<1x128xf32, #tpu.memory_space<vmem>>, vector<1x128xf32>
    %6 = vector.broadcast %5 : vector<1x128xf32> to vector<16x128xf32>
    %7 = arith.addf %4, %6 : vector<16x128xf32>
    %cst = arith.constant 0.000000e+00 : f32
    %8 = vector.broadcast %cst : f32 to vector<16x128xf32>
    %9 = arith.maximumf %7, %8 : vector<16x128xf32>
    %10 = arith.truncf %9 : vector<16x128xf32> to vector<16x128xbf16>
    %c0_6 = arith.constant 0 : index
    %c0_7 = arith.constant 0 : index
    %c0_8 = arith.constant 0 : index
    %11 = vector.load %arg2[%c0_6, %c0_7, %c0_8] : memref<3x128x128xbf16, #tpu.memory_space<vmem>>, vector<1x128x128xbf16>
    %12 = vector.shape_cast %11 : vector<1x128x128xbf16> to vector<128x128xbf16>
    %cst_9 = arith.constant dense<0.000000e+00> : vector<16x128xf32>
    %13 = tpu.matmul %10, %12, %cst_9 {dimension_numbers = #tpu.dot_dimension_numbers<[1], [0], [0], [1], [0, 0, 1, 1], [], []>} : vector<16x128xbf16>, vector<128x128xbf16>, vector<16x128xf32> -> vector<16x128xf32>
    %c1 = arith.constant 1 : index
    %c0_10 = arith.constant 0 : index
    %c0_11 = arith.constant 0 : index
    %14 = vector.load %arg2[%c1, %c0_10, %c0_11] : memref<3x128x128xbf16, #tpu.memory_space<vmem>>, vector<1x128x128xbf16>
    %15 = vector.shape_cast %14 : vector<1x128x128xbf16> to vector<128x128xbf16>
    %cst_12 = arith.constant dense<0.000000e+00> : vector<16x128xf32>
    %16 = tpu.matmul %10, %15, %cst_12 {dimension_numbers = #tpu.dot_dimension_numbers<[1], [0], [0], [1], [0, 0, 1, 1], [], []>} : vector<16x128xbf16>, vector<128x128xbf16>, vector<16x128xf32> -> vector<16x128xf32>
    %c2 = arith.constant 2 : index
    %c0_13 = arith.constant 0 : index
    %c0_14 = arith.constant 0 : index
    %17 = vector.load %arg2[%c2, %c0_13, %c0_14] : memref<3x128x128xbf16, #tpu.memory_space<vmem>>, vector<1x128x128xbf16>
    %18 = vector.shape_cast %17 : vector<1x128x128xbf16> to vector<128x128xbf16>
    %cst_15 = arith.constant dense<0.000000e+00> : vector<16x128xf32>
    %19 = tpu.matmul %10, %18, %cst_15 {dimension_numbers = #tpu.dot_dimension_numbers<[1], [0], [0], [1], [0, 0, 1, 1], [], []>} : vector<16x128xbf16>, vector<128x128xbf16>, vector<16x128xf32> -> vector<16x128xf32>
    %20 = tpu.iota {dimensions = array<i32: 0>} : vector<16x1xi32>
    %c16_i32 = arith.constant 16 : i32
    %c0_i32 = arith.constant 0 : i32
    %21 = arith.cmpi eq, %c16_i32, %c0_i32 : i32
    %c1_i32 = arith.constant 1 : i32
    %22 = arith.select %21, %c1_i32, %c16_i32 : i32
    %23 = vector.broadcast %22 : i32 to vector<16x1xi32>
    %24 = arith.remsi %20, %23 : vector<16x1xi32>
    %c0_i32_16 = arith.constant 0 : i32
    %25 = vector.broadcast %c0_i32_16 : i32 to vector<16x1xi32>
    %26 = arith.cmpi ne, %24, %25 : vector<16x1xi32>
    %c0_i32_17 = arith.constant 0 : i32
    %27 = vector.broadcast %c0_i32_17 : i32 to vector<16x1xi32>
    %28 = arith.cmpi slt, %24, %27 : vector<16x1xi32>
    %c0_i32_18 = arith.constant 0 : i32
    %29 = arith.cmpi slt, %22, %c0_i32_18 : i32
    %30 = vector.broadcast %29 : i1 to vector<16x1xi1>
    %31 = vector.broadcast %30 : vector<16x1xi1> to vector<16x1xi1>
    %32 = arith.xori %28, %31 : vector<16x1xi1>
    %33 = arith.andi %32, %26 : vector<16x1xi1>
    %34 = vector.broadcast %22 : i32 to vector<16x1xi32>
    %35 = arith.addi %24, %34 : vector<16x1xi32>
    %36 = arith.select %33, %35, %24 : vector<16x1xi1>, vector<16x1xi32>
    %c0_i32_19 = arith.constant 0 : i32
    %37 = vector.broadcast %c0_i32_19 : i32 to vector<16x1xi32>
    %38 = arith.cmpi eq, %36, %37 : vector<16x1xi32>
    %c1_i32_20 = arith.constant 1 : i32
    %39 = tpu.dynamic_rotate %13 by %c1_i32_20 dim 0 : vector<16x128xf32>, i32 -> vector<16x128xf32>
    %cst_21 = arith.constant 0.000000e+00 : f32
    %40 = vector.shape_cast %38 : vector<16x1xi1> to vector<16x1xi1>
    %41 = vector.broadcast %40 : vector<16x1xi1> to vector<16x128xi1>
    %42 = vector.broadcast %cst_21 : f32 to vector<16x128xf32>
    %43 = arith.select %41, %42, %39 : vector<16x128xi1>, vector<16x128xf32>
    %44 = arith.addf %16, %43 : vector<16x128xf32>
    %c15_i32 = arith.constant 15 : i32
    %45 = vector.broadcast %c15_i32 : i32 to vector<16x1xi32>
    %46 = arith.cmpi eq, %36, %45 : vector<16x1xi32>
    %c15_i32_22 = arith.constant 15 : i32
    %47 = tpu.dynamic_rotate %19 by %c15_i32_22 dim 0 : vector<16x128xf32>, i32 -> vector<16x128xf32>
    %cst_23 = arith.constant 0.000000e+00 : f32
    %48 = vector.shape_cast %46 : vector<16x1xi1> to vector<16x1xi1>
    %49 = vector.broadcast %48 : vector<16x1xi1> to vector<16x128xi1>
    %50 = vector.broadcast %cst_23 : f32 to vector<16x128xf32>
    %51 = arith.select %49, %50, %47 : vector<16x128xi1>, vector<16x128xf32>
    %52 = arith.addf %44, %51 : vector<16x128xf32>
    %53 = vector.shape_cast %52 : vector<16x128xf32> to vector<1x16x128xf32>
    %c0_24 = arith.constant 0 : index
    %c0_25 = arith.constant 0 : index
    %c0_26 = arith.constant 0 : index
    %54 = vector.load %arg5[%c0_24, %c0_25, %c0_26] : memref<1x16x128xf32, #tpu.memory_space<vmem>>, vector<1x16x128xf32>
    tpu.vector_store %arg5[%c0_24, %c0_25, %c0_26], %53 {strides = array<i32>} : memref<1x16x128xf32, #tpu.memory_space<vmem>>, vector<1x16x128xf32>,
    %cst_27 = arith.constant dense<0.000000e+00> : vector<128xf32>
    %55 = vector.multi_reduction <add>, %52, %cst_27 [0] : vector<16x128xf32> to vector<128xf32>
    %56 = vector.shape_cast %55 : vector<128xf32> to vector<1x128xf32>
    %c0_28 = arith.constant 0 : index
    %c0_29 = arith.constant 0 : index
    %c0_30 = arith.constant 0 : index
    %57 = vector.load %arg6[%c0_28, %c0_29, %c0_30] : memref<1x1x128xf32, #tpu.memory_space<vmem>>, vector<1x1x128xf32>
    %58 = vector.shape_cast %57 : vector<1x1x128xf32> to vector<1x128xf32>
    %59 = vector.shape_cast %56 : vector<1x128xf32> to vector<1x1x128xf32>
    tpu.vector_store %arg6[%c0_28, %c0_29, %c0_30], %59 {strides = array<i32>} : memref<1x1x128xf32, #tpu.memory_space<vmem>>, vector<1x1x128xf32>,
    %60 = arith.mulf %52, %52 : vector<16x128xf32>
    %cst_31 = arith.constant dense<0.000000e+00> : vector<128xf32>
    %61 = vector.multi_reduction <add>, %60, %cst_31 [0] : vector<16x128xf32> to vector<128xf32>
    %62 = vector.shape_cast %61 : vector<128xf32> to vector<1x128xf32>
    %c0_32 = arith.constant 0 : index
    %c0_33 = arith.constant 0 : index
    %c0_34 = arith.constant 0 : index
    %63 = vector.load %arg7[%c0_32, %c0_33, %c0_34] : memref<1x1x128xf32, #tpu.memory_space<vmem>>, vector<1x1x128xf32>
    %64 = vector.shape_cast %63 : vector<1x1x128xf32> to vector<1x128xf32>
    %65 = vector.shape_cast %62 : vector<1x128xf32> to vector<1x1x128xf32>
    tpu.vector_store %arg7[%c0_32, %c0_33, %c0_34], %65 {strides = array<i32>} : memref<1x1x128xf32, #tpu.memory_space<vmem>>, vector<1x1x128xf32>,
    return
  }
  func.func @transform_0(%arg0: i32) -> (i32, i32, i32) {
    %c0_i32 = arith.constant 0 : i32
    %c0_i32_0 = arith.constant 0 : i32
    %c0_i32_1 = arith.constant 0 : i32
    return %arg0, %c0_i32, %c0_i32_0 : i32, i32, i32
  }
  func.func @transform_1(%arg0: i32) -> (i32, i32, i32) {
    %c0_i32 = arith.constant 0 : i32
    %c0_i32_0 = arith.constant 0 : i32
    %c0_i32_1 = arith.constant 0 : i32
    %c0_i32_2 = arith.constant 0 : i32
    return %c0_i32, %c0_i32_0, %c0_i32_1 : i32, i32, i32
  }
  func.func @transform_2(%arg0: i32) -> (i32, i32) {
    %c0_i32 = arith.constant 0 : i32
    %c0_i32_0 = arith.constant 0 : i32
    %c0_i32_1 = arith.constant 0 : i32
    return %c0_i32, %c0_i32_0 : i32, i32
  }
  func.func @transform_3(%arg0: i32) -> (i32, i32) {
    %c0_i32 = arith.constant 0 : i32
    %c0_i32_0 = arith.constant 0 : i32
    %c0_i32_1 = arith.constant 0 : i32
    return %c0_i32, %c0_i32_0 : i32, i32
  }
  func.func @transform_4(%arg0: i32) -> (i32, i32, i32) {
    %c0_i32 = arith.constant 0 : i32
    %c0_i32_0 = arith.constant 0 : i32
    %c0_i32_1 = arith.constant 0 : i32
    return %arg0, %c0_i32, %c0_i32_0 : i32, i32, i32
  }
  func.func @transform_5(%arg0: i32) -> (i32, i32, i32) {
    %c0_i32 = arith.constant 0 : i32
    %c0_i32_0 = arith.constant 0 : i32
    %c0_i32_1 = arith.constant 0 : i32
    return %arg0, %c0_i32, %c0_i32_0 : i32, i32, i32
  }
  func.func @transform_6(%arg0: i32) -> (i32, i32, i32) {
    %c0_i32 = arith.constant 0 : i32
    %c0_i32_0 = arith.constant 0 : i32
    %c0_i32_1 = arith.constant 0 : i32
    return %arg0, %c0_i32, %c0_i32_0 : i32, i32, i32
  }
}

module attributes {stable_mosaic.version = 11 : i64} {
  func.func @_scale_shift_relu_kernel(%arg0: i32, %arg1: memref<16x128xf32, #tpu.memory_space<vmem>>, %arg2: memref<1x128xf32, #tpu.memory_space<vmem>>, %arg3: memref<1x128xf32, #tpu.memory_space<vmem>>, %arg4: memref<16x128xf32, #tpu.memory_space<vmem>>) attributes {dimension_semantics = [#tpu.dimension_semantics<parallel>], iteration_bounds = array<i64: 2>, scalar_prefetch = 0 : i64, scratch_operands = 0 : i64, tpu.core_type = #tpu.core_type<tc>, window_params = [{transform_indices = @transform_0, window_bounds = array<i64: 16, 128>}, {pipeline_mode = #tpu.pipeline_mode<synchronous>, transform_indices = @transform_1, window_bounds = array<i64: 1, 128>}, {pipeline_mode = #tpu.pipeline_mode<synchronous>, transform_indices = @transform_2, window_bounds = array<i64: 1, 128>}, {transform_indices = @transform_3, window_bounds = array<i64: 16, 128>}]} {
    %c0 = arith.constant 0 : index
    %c0_0 = arith.constant 0 : index
    %0 = vector.load %arg1[%c0, %c0_0] : memref<16x128xf32, #tpu.memory_space<vmem>>, vector<16x128xf32>
    %c0_1 = arith.constant 0 : index
    %c0_2 = arith.constant 0 : index
    %1 = vector.load %arg2[%c0_1, %c0_2] : memref<1x128xf32, #tpu.memory_space<vmem>>, vector<1x128xf32>
    %2 = vector.broadcast %1 : vector<1x128xf32> to vector<16x128xf32>
    %3 = arith.mulf %0, %2 : vector<16x128xf32>
    %c0_3 = arith.constant 0 : index
    %c0_4 = arith.constant 0 : index
    %4 = vector.load %arg3[%c0_3, %c0_4] : memref<1x128xf32, #tpu.memory_space<vmem>>, vector<1x128xf32>
    %5 = vector.broadcast %4 : vector<1x128xf32> to vector<16x128xf32>
    %6 = arith.addf %3, %5 : vector<16x128xf32>
    %cst = arith.constant 0.000000e+00 : f32
    %7 = vector.broadcast %cst : f32 to vector<16x128xf32>
    %8 = arith.maximumf %6, %7 : vector<16x128xf32>
    %c0_5 = arith.constant 0 : index
    %c0_6 = arith.constant 0 : index
    %9 = vector.load %arg4[%c0_5, %c0_6] : memref<16x128xf32, #tpu.memory_space<vmem>>, vector<16x128xf32>
    tpu.vector_store %arg4[%c0_5, %c0_6], %8 {strides = array<i32>} : memref<16x128xf32, #tpu.memory_space<vmem>>, vector<16x128xf32>,
    return
  }
  func.func @transform_0(%arg0: i32) -> (i32, i32) {
    %c0_i32 = arith.constant 0 : i32
    %c0_i32_0 = arith.constant 0 : i32
    return %arg0, %c0_i32 : i32, i32
  }
  func.func @transform_1(%arg0: i32) -> (i32, i32) {
    %c0_i32 = arith.constant 0 : i32
    %c0_i32_0 = arith.constant 0 : i32
    %c0_i32_1 = arith.constant 0 : i32
    return %c0_i32, %c0_i32_0 : i32, i32
  }
  func.func @transform_2(%arg0: i32) -> (i32, i32) {
    %c0_i32 = arith.constant 0 : i32
    %c0_i32_0 = arith.constant 0 : i32
    %c0_i32_1 = arith.constant 0 : i32
    return %c0_i32, %c0_i32_0 : i32, i32
  }
  func.func @transform_3(%arg0: i32) -> (i32, i32) {
    %c0_i32 = arith.constant 0 : i32
    %c0_i32_0 = arith.constant 0 : i32
    return %arg0, %c0_i32 : i32, i32
  }
}

</mosaic_0001>

<bundles_post_ra>
// kernel: tile.23
= control target key start
LH: loop header
LB: loop body
LE: loop exit
PB: predicated region body
PF: predicated region fallthrough
CT: control target
= control target key end

     0   :  { %s28_s0 = inlined_call_operand.vmem [shape: f32[8], index: 0, kind: input, shape index: {}]   ;;  %s29_s1 = inlined_call_operand.vmem [shape: f32[16,8], index: 1, kind: output, shape index: {}]  }
   0x1   :  { %v4_v0 = vld [vmem:[%s28_s0] ss:$0 sm:$0xff] }
   0x2   :  { %5 = vst [vmem:[%s29_s1] sm:$0xff] %v4_v0 }
   0x3   :  { %8 = vst [vmem:[%s29_s1 + $0x8] sm:$0xff] %v4_v0 }

// kernel: tile.24
= control target key start
LH: loop header
LB: loop body
LE: loop exit
PB: predicated region body
PF: predicated region fallthrough
CT: control target
= control target key end

     0   :  { %s131_s10 = smov 120   ;;  %s132_s11 = smov 104   ;;  %vm3_vm0 = vcmask 64512   ;;  %vm9_vm1 = vcmask 1048512   ;;  %vm15_vm2 = vcmask 982912   ;;  %vm21_vm3 = vcmask 917312   ;;  %s207_s0 = inlined_call_operand.vmem [shape: f32[16,8], index: 0, kind: input, shape index: {}]   ;;  %s208_s1 = inlined_call_operand.vmem [shape: f32[1,128], index: 1, kind: output, shape index: {}]  }
   0x1   :  { %v101_v0 = vld [vmem:[%s207_s0 + $0xf] sm:$0x1]   ;;  %v103_v1 = vld [vmem:[%s207_s0 + $0xd] sm:$0x1]   ;;  %v105_v2 = vld [vmem:[%s207_s0 + $0xb] sm:$0x1]  }
   0x2   :  { %7 = vrot.lane.b32.xlu0 %v101_v0, %s131_s10  ;;  %19 = vrot.lane.b32.xlu1 %v103_v1, %s132_s11  ;;  %s133_s14 = smov 88   ;;  %v102_v3 = vld [vmem:[%s207_s0 + $0xe] sm:$0x1]   ;;  %v104_v4 = vld [vmem:[%s207_s0 + $0xc] sm:$0x1]   ;;  %s134_s19 = smov 112  }
   0x3   :  { %31 = vrot.lane.b32.xlu2 %v105_v2, %s133_s14  ;;  %s135_s20 = smov 96   ;;  %v106_v5 = vld [vmem:[%s207_s0 + $0xa] sm:$0x1]   ;;  %s136_s23 = smov 80   ;;  %v107_v6 = vld [vmem:[%s207_s0 + $0x9] sm:$0x1]  }
   0x4   :  { %v108_v7 = vld [vmem:[%s207_s0 + $0x8] sm:$0x1]   ;;  %s137_s28 = smov 72   ;;  %s138_s29 = smov 64   ;;  %v109_v8 = vld [vmem:[%s207_s0 + $0x7] sm:$0x1]  }
   0x5   :  { %s139_s3 = smov 56   ;;  %v110_v9 = vld [vmem:[%s207_s0 + $0x6] sm:$0x1]   ;;  %v111_v10 = vld [vmem:[%s207_s0 + $0x5] sm:$0x1]   ;;  %s140_s8 = smov 48  }
   0x6   :  { %s141_s9 = smov 40   ;;  %v112_v11 = vld [vmem:[%s207_s0 + $0x4] sm:$0x1]   ;;  %s142_s12 = smov 32   ;;  %v113_v12 = vld [vmem:[%s207_s0 + $0x3] sm:$0x1]  }
   0x7   :  { %v114_v13 = vld [vmem:[%s207_s0 + $0x2] sm:$0x1]   ;;  %s143_s17 = smov 24   ;;  %s144_s18 = smov 16   ;;  %v115_v14 = vld [vmem:[%s207_s0 + $0x1] sm:$0x1]  }
   0x8   :  { %s145_s21 = smov 8   ;;  %v2_v15 = vld [vmem:[%s207_s0] sm:$0x1]   ;;  %vm27_vm4 = vcmask 851712   ;;  %vm33_vm5 = vcmask 786112   ;;  %vm39_vm6 = vcmask 720512  }
   0x9   :  { %4 = vst.msk [vmem:[#allocation0] sm:$0x1] %vm3_vm0, %v2_v15   ;;  %vm45_vm7 = vcmask 654912   ;;  %vm51_vm8 = vcmask 589312   ;;  %vm57_vm9 = vcmask 523712   ;;  %vm63_vm10 = vcmask 458112  }
   0xa   :  { %13 = vrot.lane.b32.xlu0 %v102_v3, %s134_s19  ;;  %25 = vrot.lane.b32.xlu1 %v104_v4, %s135_s20  ;;  %vm69_vm11 = vcmask 392512   ;;  %vm75_vm12 = vcmask 326912   ;;  %vm81_vm13 = vcmask 261312   ;;  %vm87_vm14 = vcmask 195712  }
   0xb   :  { %37 = vrot.lane.b32.xlu2 %v106_v5, %s136_s23  ;;  %vm93_vm15 = vcmask 130112  }
  0x12   :  { %43 = vrot.lane.b32.xlu0 %v107_v6, %s137_s28  ;;  %49 = vrot.lane.b32.xlu1 %v108_v7, %s138_s29 }
  0x13   :  { %55 = vrot.lane.b32.xlu2 %v109_v8, %s139_s3 }
  0x1a   :  { %61 = vrot.lane.b32.xlu0 %v110_v9, %s140_s8  ;;  %67 = vrot.lane.b32.xlu1 %v111_v10, %s141_s9 }
  0x1b   :  { %73 = vrot.lane.b32.xlu2 %v112_v11, %s142_s12 }
  0x22   :  { %79 = vrot.lane.b32.xlu0 %v113_v12, %s143_s17  ;;  %85 = vrot.lane.b32.xlu1 %v114_v13, %s144_s18 }
  0x23   :  { %91 = vrot.lane.b32.xlu2 %v115_v14, %s145_s21 }
  0x5d   :  { %v32_v16 = vpop.permute.xlu2 %31  }
  0x65   :  { %v38_v17 = vpop.permute.xlu2 %37  }
  0x6d   :  { %v56_v18 = vpop.permute.xlu2 %55  }
  0x74   :  { %v8_v19 = vpop.permute.xlu0 %7   ;;  %v20_v20 = vpop.permute.xlu1 %19  }
  0x75   :  { %10 = vst.msk [vmem:[#allocation0] sm:$0x1] %vm9_vm1, %v8_v19   ;;  %v74_v21 = vpop.permute.xlu2 %73  }
  0x7c   :  { %v14_v22 = vpop.permute.xlu0 %13   ;;  %v26_v23 = vpop.permute.xlu1 %25  }
  0x7d   :  { %16 = vst.msk [vmem:[#allocation0] sm:$0x1] %vm15_vm2, %v14_v22   ;;  %v92_v24 = vpop.permute.xlu2 %91  }
  0x7e   :  { %22 = vst.msk [vmem:[#allocation0] sm:$0x1] %vm21_vm3, %v20_v20  }
  0x7f   :  { %28 = vst.msk [vmem:[#allocation0] sm:$0x1] %vm27_vm4, %v26_v23  }
  0x80   :  { %34 = vst.msk [vmem:[#allocation0] sm:$0x1] %vm33_vm5, %v32_v16  }
  0x81   :  { %40 = vst.msk [vmem:[#allocation0] sm:$0x1] %vm39_vm6, %v38_v17  }
  0x84   :  { %v44_v25 = vpop.permute.xlu0 %43   ;;  %v50_v26 = vpop.permute.xlu1 %49  }
  0x85   :  { %46 = vst.msk [vmem:[#allocation0] sm:$0x1] %vm45_vm7, %v44_v25  }
  0x86   :  { %52 = vst.msk [vmem:[#allocation0] sm:$0x1] %vm51_vm8, %v50_v26  }
  0x87   :  { %58 = vst.msk [vmem:[#allocation0] sm:$0x1] %vm57_vm9, %v56_v18  }
  0x8c   :  { %v62_v27 = vpop.permute.xlu0 %61   ;;  %v68_v28 = vpop.permute.xlu1 %67  }
  0x8d   :  { %64 = vst.msk [vmem:[#allocation0] sm:$0x1] %vm63_vm10, %v62_v27  }
  0x8e   :  { %70 = vst.msk [vmem:[#allocation0] sm:$0x1] %vm69_vm11, %v68_v28  }
  0x8f   :  { %76 = vst.msk [vmem:[#allocation0] sm:$0x1] %vm75_vm12, %v74_v21  }
  0x94   :  { %v80_v29 = vpop.permute.xlu0 %79   ;;  %v86_v30 = vpop.permute.xlu1 %85  }
  0x95   :  { %82 = vst.msk [vmem:[#allocation0] sm:$0x1] %vm81_vm13, %v80_v29  }
  0x96   :  { %88 = vst.msk [vmem:[#allocation0] sm:$0x1] %vm87_vm14, %v86_v30  }
  0x97   :  { %94 = vst.msk [vmem:[#allocation0] sm:$0x1] %vm93_vm15, %v92_v24  }
  0x9e   :  { %v97_v31 = vld [vmem:[#allocation0] sm:$0x1] }
  0x9f   :  { %100 = vst [vmem:[%s208_s1] sm:$0x1] %v97_v31 }

// kernel: up_forward.3
= control target key start
LH: loop header
LB: loop body
LE: loop exit
PB: predicated region body
PF: predicated region fallthrough
CT: control target
= control target key end

     0   :  { %s904_s21 = smov 0   ;;  %s1012_s0 = inlined_call_operand.vmem [shape: f32[2,16,128], index: 0, kind: input, shape index: {}]   ;;  %s1013_s1 = inlined_call_operand.vmem [shape: bf16[3,128,128], index: 1, kind: input, shape index: {}]   ;;  %s1014_s2 = inlined_call_operand.vmem [shape: f32[1,128], index: 2, kind: input, shape index: {}, may-alias: {2,3}]   ;;  %s1015_s3 = inlined_call_operand.vmem [shape: f32[1,128], index: 3, kind: input, shape index: {}, may-alias: {2,3}]   ;;  %s1016_s4 = inlined_call_operand.vmem [shape: f32[2,16,128], index: 4, kind: output, shape index: {0}]   ;;  %s1017_s5 = inlined_call_operand.vmem [shape: f32[2,1,128], index: 5, kind: output, shape index: {1}]   ;;  %s1018_s6 = inlined_call_operand.vmem [shape: f32[2,1,128], index: 6, kind: output, shape index: {2}]  }
   0x1 LB: > { %s688_s2 = sadd.s32 4294967295, %s867_s21   ;;  %p692_p0 = scmp.ge.s32.totalorder %s867_s21, 1  ;;  %s867_s21 = sphi %s904_s21, %s17_s21  }
   0x2   : > { %p217_p1 = scmp.lt.s32.totalorder %s867_s21, 3 }
   0x4   : > { %p218_p2 = pnand %p692_p0, %p217_p1 }
   0x5   : > { %p253_p3 = scmp.lt.s32.totalorder (!%p218_p2), %s688_s2, 1 }
   0x6   : > { %221 = sbr.rel (%p218_p2) target bundleno = 206 (0xce), region = 36 }
   0xb   : > { %v836_v0 = vld [vmem:[%s1013_s1 + $0x38] sm:$0xff]  ;;  %v835_v3 = vld [vmem:[%s1013_s1 + $0x30] sm:$0xff]  ;;  %v834_v6 = vld [vmem:[%s1013_s1 + $0x28] sm:$0xff]  ;;  %s1020_s2 = smov (!%p253_p3, %s688_s2), 1  ;;  %v446_v27 = vlaneseq }
   0xc   : > { %v852_v1 = vld [vmem:[%s1013_s1 + $0xb8] sm:$0xff]  ;;  %336 = vmatpush.bf16.msra.mxu0 %v836_v0  ;;  %v851_v4 = vld [vmem:[%s1013_s1 + $0xb0] sm:$0xff]  ;;  %v850_v7 = vld [vmem:[%s1013_s1 + $0xa8] sm:$0xff]  ;;  %s827_s9 = sshll.u32 %s1020_s2, 4  ;;  %s265_s30 = scalar_lea.vmem %s1017_s5, %s1020_s2 }
   0xd   : > { %v844_v2 = vld [vmem:[%s1013_s1 + $0x78] sm:$0xff]  ;;  %432 = vmatpush.bf16.msra.mxu1 %v852_v1  ;;  %v843_v5 = vld [vmem:[%s1013_s1 + $0x70] sm:$0xff]  ;;  %v842_v8 = vld [vmem:[%s1013_s1 + $0x68] sm:$0xff]  ;;  %s257_s18 = scalar_lea.vmem %s1012_s0, %s827_s9  ;;  %v447_v30 = vshrl.u32 %v446_v27, 7  ;;  %s262_s27 = scalar_lea.vmem %s1016_s4, %s827_s9 }
   0xe   : > { %534 = vmatpush.bf16.msra.mxu2 %v844_v2  ;;  %v833_v9 = vld [vmem:[%s1013_s1 + $0x20] sm:$0xff]  ;;  %v832_v12 = vld [vmem:[%s1013_s1 + $0x18] sm:$0xff]  ;;  %v831_v15 = vld [vmem:[%s1013_s1 + $0x10] sm:$0xff]  ;;  %s268_s9 = scalar_lea.vmem %s1018_s6, %s1020_s2 }
   0xf   : > { %v849_v10 = vld [vmem:[%s1013_s1 + $0xa0] sm:$0xff]  ;;  %v848_v13 = vld [vmem:[%s1013_s1 + $0x98] sm:$0xff]  ;;  %v847_v16 = vld [vmem:[%s1013_s1 + $0x90] sm:$0xff]  ;;  %v453_v31 = vand.u32 15, %v447_v30  ;;  %v448_v32 = vadd.s32 8, %v447_v30  ;;  %vm477_vm0 = vcmp.lt.s32.totalorder %v447_v30, 1 }
  0x10   : > { %337 = vmatpush.bf16.msra.mxu0 %v835_v3  ;;  %v841_v11 = vld [vmem:[%s1013_s1 + $0x60] sm:$0xff]  ;;  %v840_v14 = vld [vmem:[%s1013_s1 + $0x58] sm:$0xff]  ;;  %v839_v17 = vld [vmem:[%s1013_s1 + $0x50] sm:$0xff]  ;;  %vm552_vm2 = vcmp.lt.s32.totalorder %v447_v30, 7 }
  0x11   : > { %433 = vmatpush.bf16.msra.mxu1 %v851_v4  ;;  %v830_v18 = vld [vmem:[%s1013_s1 + $0x8] sm:$0xff]  ;;  %v829_v21 = vld [vmem:[%s1013_s1] sm:$0xff]  ;;  %vm473_vm1 = vcmp.eq.s32.totalorder %v453_v31, 0  ;;  %v460_v39 = vand.u32 15, %v448_v32 }
  0x12   : > { %535 = vmatpush.bf16.msra.mxu2 %v843_v5  ;;  %v846_v19 = vld [vmem:[%s1013_s1 + $0x88] sm:$0xff]  ;;  %v845_v22 = vld [vmem:[%s1013_s1 + $0x80] sm:$0xff] }
  0x13   : > { %v838_v20 = vld [vmem:[%s1013_s1 + $0x48] sm:$0xff]  ;;  %v269_v23 = vld [vmem:[%s257_s18] sm:$0xff]  ;;  %vm549_vm3 = vcmp.eq.s32.totalorder %v460_v39, 15 }
  0x14   : > { %338 = vmatpush.bf16.msra.mxu0 %v834_v6  ;;  %v270_v24 = vld [vmem:[%s257_s18 + $0x8] sm:$0xff]  ;;  %v837_v25 = vld [vmem:[%s1013_s1 + $0x40] sm:$0xff] }
  0x15   : > { %434 = vmatpush.bf16.msra.mxu1 %v850_v7  ;;  %v271_v26 = vpack.c.bf16 %v270_v24, %v269_v23 }
  0x16   : > { %536 = vmatpush.bf16.msra.mxu2 %v842_v8 }
  0x18   : > { %339 = vmatpush.bf16.msra.mxu0 %v833_v9 }
  0x19   : > { %435 = vmatpush.bf16.msra.mxu1 %v849_v10 }
  0x1a   : > { %537 = vmatpush.bf16.msra.mxu2 %v841_v11 }
  0x1c   : > { %340 = vmatpush.bf16.msra.mxu0 %v832_v12 }
  0x1d   : > { %436 = vmatpush.bf16.msra.mxu1 %v848_v13 }
  0x1e   : > { %538 = vmatpush.bf16.msra.mxu2 %v840_v14 }
  0x20   : > { %341 = vmatpush.bf16.msra.mxu0 %v831_v15 }
  0x21   : > { %437 = vmatpush.bf16.msra.mxu1 %v847_v16 }
  0x22   : > { %539 = vmatpush.bf16.msra.mxu2 %v839_v17 }
  0x24   : > { %342 = vmatpush.bf16.msra.mxu0 %v830_v18 }
  0x25   : > { %438 = vmatpush.bf16.msra.mxu1 %v846_v19 }
  0x26   : > { %540 = vmatpush.bf16.msra.mxu2 %v838_v20 }
  0x28   : > { %343 = vmatpush.bf16.msra.mxu0 %v829_v21 }
  0x29   : > { %439 = vmatpush.bf16.msra.mxu1 %v845_v22 }
  0x2a   : > { %541 = vmatpush.bf16.msra.mxu2 %v837_v25 }
  0x2b   : > { %344 = vmatmul.bf16.vlgmr.msra.gmra.mxu0 %v271_v26 }
  0x2c   : > { %440 = vmatmul.bf16.vlgmr.msra.gmra.mxu1 %v271_v26 }
  0x2d   : > { %542 = vmatmul.bf16.vlgmr.msra.gmra.mxu2 %v271_v26 }
  0xa8   : > { %v345_v28 = vpop.f32.mrf.mxu0 }
  0xa9   : > { %v441_v29 = vpop.f32.mrf.mxu1  ;;  %v475_v36 = vrot.slane %v345_v28, 7 }
  0xaa   : > { %v550_v41 = vrot.slane %v441_v29, 1 }
  0xb0   : > { %v543_v33 = vpop.f32.mrf.mxu2  ;;  %v347_v34 = vpop.f32.mrf.mxu0 }
  0xb1   : > { %v443_v35 = vpop.f32.mrf.mxu1  ;;  %v476_v37 = vrot.slane %v347_v34, 7 }
  0xb2   : > { %v551_v38 = vrot.slane %v443_v35, 1 }
  0xb3   : > { %v479_v40 = vsel %vm477_vm0, %v476_v37, %v475_v36  ;;  %v478_v46 = vsel %vm477_vm0, %v475_v36, %v476_v37 }
  0xb4   : > { %v484_v42 = vsel %vm473_vm1, 0.0, %v479_v40  ;;  %v553_v44 = vsel %vm552_vm2, %v550_v41, %v551_v38  ;;  %v554_v45 = vsel %vm552_vm2, %v551_v38, %v550_v41 }
  0xb5   : > { %v544_v43 = vadd.f32 %v543_v33, %v484_v42  ;;  %v560_v50 = vsel %vm549_vm3, 0.0, %v554_v45 }
  0xb7   : > { %v561_v48 = vadd.f32 %v553_v44, %v544_v43 }
  0xb8   : > { %v545_v47 = vpop.f32.mrf.mxu2 }
  0xb9   : > { %v546_v49 = vadd.f32 %v545_v47, %v478_v46  ;;  %563 = vst [vmem:[%s262_s27] sm:$0xff] %v561_v48  ;;  %v573_v53 = vmul.f32 %v561_v48, %v561_v48 }
  0xbb   : > { %v562_v51 = vadd.f32 %v560_v50, %v546_v49 }
  0xbd   : > { %564 = vst [vmem:[%s262_s27 + $0x8] sm:$0xff] %v562_v51  ;;  %v565_v52 = vadd.f32 %v562_v51, %v561_v48  ;;  %v574_v54 = vmul.f32 %v562_v51, %v562_v51 }
  0xbf   : > { %v566_v55 = vrot.slane %v565_v52, 4  ;;  %v575_v56 = vadd.f32 %v574_v54, %v573_v53 }
  0xc1   : > { %v567_v57 = vadd.f32 %v566_v55, %v565_v52  ;;  %v576_v58 = vrot.slane %v575_v56, 4 }
  0xc3   : > { %v568_v59 = vrot.slane %v567_v57, 2  ;;  %v577_v60 = vadd.f32 %v576_v58, %v575_v56 }
  0xc5   : > { %v569_v61 = vadd.f32 %v568_v59, %v567_v57  ;;  %v578_v62 = vrot.slane %v577_v60, 2 }
  0xc7   : > { %v570_v63 = vrot.slane %v569_v61, 1  ;;  %v579_v0 = vadd.f32 %v578_v62, %v577_v60 }
  0xc9   : > { %v571_v1 = vadd.f32 %v570_v63, %v569_v61  ;;  %v580_v2 = vrot.slane %v579_v0, 1 }
  0xcb   : > { %572 = vst [vmem:[%s265_s30] sm:$0x1] %v571_v1  ;;  %v581_v3 = vadd.f32 %v580_v2, %v579_v0 }
  0xcd   : > { %582 = vst [vmem:[%s268_s9] sm:$0x1] %v581_v3 }
  0xce PF: > { %s17_s21 = sadd.s32 1, %s867_s21  }
  0xcf   : > { %p14_p4 = scmp.ge.s32.totalorder %s17_s21, 4  }
  0xd1   :  { %16 = sbr.rel (!%p14_p4) target bundleno = 1 (0x1), region = 92 }

// kernel: up_forward.4
= control target key start
LH: loop header
LB: loop body
LE: loop exit
PB: predicated region body
PF: predicated region fallthrough
CT: control target
= control target key end

     0   :  { %s920_s21 = smov 0   ;;  %s1030_s0 = inlined_call_operand.vmem [shape: f32[2,16,128], index: 0, kind: input, shape index: {}]   ;;  %s1031_s1 = inlined_call_operand.vmem [shape: bf16[3,128,128], index: 1, kind: input, shape index: {}]   ;;  %s1032_s2 = inlined_call_operand.vmem [shape: f32[1,128], index: 2, kind: input, shape index: {}]   ;;  %s1033_s3 = inlined_call_operand.vmem [shape: f32[1,128], index: 3, kind: input, shape index: {}]   ;;  %s1034_s4 = inlined_call_operand.vmem [shape: f32[2,16,128], index: 4, kind: output, shape index: {0}]   ;;  %s1035_s5 = inlined_call_operand.vmem [shape: f32[2,1,128], index: 5, kind: output, shape index: {1}]   ;;  %s1036_s6 = inlined_call_operand.vmem [shape: f32[2,1,128], index: 6, kind: output, shape index: {2}]  }
   0x1 LB: > { %s702_s22 = sadd.s32 4294967295, %s883_s21   ;;  %p706_p0 = scmp.ge.s32.totalorder %s883_s21, 1  ;;  %s883_s21 = sphi %s920_s21, %s17_s21  }
   0x2   : > { %p217_p1 = scmp.lt.s32.totalorder %s883_s21, 3 }
   0x4   : > { %p218_p2 = pnand %p706_p0, %p217_p1 }
   0x5   : > { %p253_p3 = scmp.lt.s32.totalorder (!%p218_p2), %s702_s22, 1 }
   0x6   : > { %221 = sbr.rel (%p218_p2) target bundleno = 206 (0xce), region = 36 }
   0xb   : > { %v850_v0 = vld [vmem:[%s1031_s1 + $0x38] sm:$0xff]  ;;  %v849_v3 = vld [vmem:[%s1031_s1 + $0x30] sm:$0xff]  ;;  %s1038_s22 = smov (!%p253_p3, %s702_s22), 1  ;;  %v848_v6 = vld [vmem:[%s1031_s1 + $0x28] sm:$0xff]  ;;  %v460_v35 = vlaneseq }
   0xc   : > { %v866_v1 = vld [vmem:[%s1031_s1 + $0xb8] sm:$0xff]  ;;  %350 = vmatpush.bf16.msra.mxu0 %v850_v0  ;;  %v865_v4 = vld [vmem:[%s1031_s1 + $0xb0] sm:$0xff]  ;;  %v864_v7 = vld [vmem:[%s1031_s1 + $0xa8] sm:$0xff]  ;;  %s841_s17 = sshll.u32 %s1038_s22, 4  ;;  %s265_s16 = scalar_lea.vmem %s1035_s5, %s1038_s22 }
   0xd   : > { %v858_v2 = vld [vmem:[%s1031_s1 + $0x78] sm:$0xff]  ;;  %446 = vmatpush.bf16.msra.mxu1 %v866_v1  ;;  %v857_v5 = vld [vmem:[%s1031_s1 + $0x70] sm:$0xff]  ;;  %v856_v8 = vld [vmem:[%s1031_s1 + $0x68] sm:$0xff]  ;;  %s257_s28 = scalar_lea.vmem %s1030_s0, %s841_s17  ;;  %v461_v38 = vshrl.u32 %v460_v35, 7  ;;  %s262_s14 = scalar_lea.vmem %s1034_s4, %s841_s17 }
   0xe   : > { %548 = vmatpush.bf16.msra.mxu2 %v858_v2  ;;  %v847_v9 = vld [vmem:[%s1031_s1 + $0x20] sm:$0xff]  ;;  %v846_v12 = vld [vmem:[%s1031_s1 + $0x18] sm:$0xff]  ;;  %v270_v16 = vld [vmem:[%s257_s28 + $0x8] sm:$0xff]  ;;  %s268_s20 = scalar_lea.vmem %s1036_s6, %s1038_s22 }
   0xf   : > { %v863_v10 = vld [vmem:[%s1031_s1 + $0xa0] sm:$0xff]  ;;  %v862_v14 = vld [vmem:[%s1031_s1 + $0x98] sm:$0xff]  ;;  %v845_v21 = vld [vmem:[%s1031_s1 + $0x10] sm:$0xff]  ;;  %v467_v39 = vand.u32 15, %v461_v38  ;;  %v462_v40 = vadd.s32 8, %v461_v38  ;;  %vm491_vm0 = vcmp.lt.s32.totalorder %v461_v38, 1 }
  0x10   : > { %351 = vmatpush.bf16.msra.mxu0 %v849_v3  ;;  %v855_v11 = vld [vmem:[%s1031_s1 + $0x60] sm:$0xff]  ;;  %v854_v17 = vld [vmem:[%s1031_s1 + $0x58] sm:$0xff]  ;;  %v861_v22 = vld [vmem:[%s1031_s1 + $0x90] sm:$0xff]  ;;  %vm566_vm2 = vcmp.lt.s32.totalorder %v461_v38, 7 }
  0x11   : > { %447 = vmatpush.bf16.msra.mxu1 %v865_v4  ;;  %v875_v13 = vld [vmem:[%s1032_s2] ss:$0 sm:$0xff]  ;;  %v853_v23 = vld [vmem:[%s1031_s1 + $0x50] sm:$0xff]  ;;  %v844_v26 = vld [vmem:[%s1031_s1 + $0x8] sm:$0xff]  ;;  %vm487_vm1 = vcmp.eq.s32.totalorder %v467_v39, 0  ;;  %v474_v47 = vand.u32 15, %v462_v40 }
  0x12   : > { %549 = vmatpush.bf16.msra.mxu2 %v857_v5  ;;  %v269_v15 = vld [vmem:[%s257_s28] sm:$0xff]  ;;  %v276_v19 = vmul.f32 %v875_v13, %v270_v16  ;;  %v860_v27 = vld [vmem:[%s1031_s1 + $0x88] sm:$0xff] }
  0x13   : > { %v275_v18 = vmul.f32 %v875_v13, %v269_v15  ;;  %v876_v20 = vld [vmem:[%s1033_s3] ss:$0 sm:$0xff]  ;;  %v852_v28 = vld [vmem:[%s1031_s1 + $0x48] sm:$0xff]  ;;  %vm563_vm3 = vcmp.eq.s32.totalorder %v474_v47, 15 }
  0x14   : > { %352 = vmatpush.bf16.msra.mxu0 %v848_v6  ;;  %v282_v25 = vadd.f32 %v876_v20, %v276_v19  ;;  %v843_v31 = vld [vmem:[%s1031_s1] sm:$0xff] }
  0x15   : > { %448 = vmatpush.bf16.msra.mxu1 %v864_v7  ;;  %v281_v24 = vadd.f32 %v876_v20, %v275_v18  ;;  %v859_v32 = vld [vmem:[%s1031_s1 + $0x80] sm:$0xff] }
  0x16   : > { %550 = vmatpush.bf16.msra.mxu2 %v856_v8  ;;  %v284_v30 = vmax.f32 %v282_v25, 0.0  ;;  %v851_v33 = vld [vmem:[%s1031_s1 + $0x40] sm:$0xff] }
  0x17   : > { %v283_v29 = vmax.f32 %v281_v24, 0.0 }
  0x18   : > { %353 = vmatpush.bf16.msra.mxu0 %v847_v9 }
  0x19   : > { %449 = vmatpush.bf16.msra.mxu1 %v863_v10  ;;  %v285_v34 = vpack.c.bf16 %v284_v30, %v283_v29 }
  0x1a   : > { %551 = vmatpush.bf16.msra.mxu2 %v855_v11 }
  0x1c   : > { %354 = vmatpush.bf16.msra.mxu0 %v846_v12 }
  0x1d   : > { %450 = vmatpush.bf16.msra.mxu1 %v862_v14 }
  0x1e   : > { %552 = vmatpush.bf16.msra.mxu2 %v854_v17 }
  0x20   : > { %355 = vmatpush.bf16.msra.mxu0 %v845_v21 }
  0x21   : > { %451 = vmatpush.bf16.msra.mxu1 %v861_v22 }
  0x22   : > { %553 = vmatpush.bf16.msra.mxu2 %v853_v23 }
  0x24   : > { %356 = vmatpush.bf16.msra.mxu0 %v844_v26 }
  0x25   : > { %452 = vmatpush.bf16.msra.mxu1 %v860_v27 }
  0x26   : > { %554 = vmatpush.bf16.msra.mxu2 %v852_v28 }
  0x28   : > { %357 = vmatpush.bf16.msra.mxu0 %v843_v31 }
  0x29   : > { %453 = vmatpush.bf16.msra.mxu1 %v859_v32 }
  0x2a   : > { %555 = vmatpush.bf16.msra.mxu2 %v851_v33 }
  0x2b   : > { %358 = vmatmul.bf16.vlgmr.msra.gmra.mxu0 %v285_v34 }
  0x2c   : > { %454 = vmatmul.bf16.vlgmr.msra.gmra.mxu1 %v285_v34 }
  0x2d   : > { %556 = vmatmul.bf16.vlgmr.msra.gmra.mxu2 %v285_v34 }
  0xa8   : > { %v359_v36 = vpop.f32.mrf.mxu0 }
  0xa9   : > { %v455_v37 = vpop.f32.mrf.mxu1  ;;  %v489_v44 = vrot.slane %v359_v36, 7 }
  0xaa   : > { %v564_v49 = vrot.slane %v455_v37, 1 }
  0xb0   : > { %v557_v41 = vpop.f32.mrf.mxu2  ;;  %v361_v42 = vpop.f32.mrf.mxu0 }
  0xb1   : > { %v457_v43 = vpop.f32.mrf.mxu1  ;;  %v490_v45 = vrot.slane %v361_v42, 7 }
  0xb2   : > { %v565_v46 = vrot.slane %v457_v43, 1 }
  0xb3   : > { %v493_v48 = vsel %vm491_vm0, %v490_v45, %v489_v44  ;;  %v492_v54 = vsel %vm491_vm0, %v489_v44, %v490_v45 }
  0xb4   : > { %v498_v50 = vsel %vm487_vm1, 0.0, %v493_v48  ;;  %v567_v52 = vsel %vm566_vm2, %v564_v49, %v565_v46  ;;  %v568_v53 = vsel %vm566_vm2, %v565_v46, %v564_v49 }
  0xb5   : > { %v558_v51 = vadd.f32 %v557_v41, %v498_v50  ;;  %v574_v58 = vsel %vm563_vm3, 0.0, %v568_v53 }
  0xb7   : > { %v575_v56 = vadd.f32 %v567_v52, %v558_v51 }
  0xb8   : > { %v559_v55 = vpop.f32.mrf.mxu2 }
  0xb9   : > { %v560_v57 = vadd.f32 %v559_v55, %v492_v54  ;;  %577 = vst [vmem:[%s262_s14] sm:$0xff] %v575_v56  ;;  %v587_v61 = vmul.f32 %v575_v56, %v575_v56 }
  0xbb   : > { %v576_v59 = vadd.f32 %v574_v58, %v560_v57 }
  0xbd   : > { %578 = vst [vmem:[%s262_s14 + $0x8] sm:$0xff] %v576_v59  ;;  %v579_v60 = vadd.f32 %v576_v59, %v575_v56  ;;  %v588_v62 = vmul.f32 %v576_v59, %v576_v59 }
  0xbf   : > { %v580_v63 = vrot.slane %v579_v60, 4  ;;  %v589_v0 = vadd.f32 %v588_v62, %v587_v61 }
  0xc1   : > { %v581_v1 = vadd.f32 %v580_v63, %v579_v60  ;;  %v590_v2 = vrot.slane %v589_v0, 4 }
  0xc3   : > { %v582_v3 = vrot.slane %v581_v1, 2  ;;  %v591_v4 = vadd.f32 %v590_v2, %v589_v0 }
  0xc5   : > { %v583_v5 = vadd.f32 %v582_v3, %v581_v1  ;;  %v592_v6 = vrot.slane %v591_v4, 2 }
  0xc7   : > { %v584_v7 = vrot.slane %v583_v5, 1  ;;  %v593_v8 = vadd.f32 %v592_v6, %v591_v4 }
  0xc9   : > { %v585_v9 = vadd.f32 %v584_v7, %v583_v5  ;;  %v594_v10 = vrot.slane %v593_v8, 1 }
  0xcb   : > { %586 = vst [vmem:[%s265_s16] sm:$0x1] %v585_v9  ;;  %v595_v11 = vadd.f32 %v594_v10, %v593_v8 }
  0xcd   : > { %596 = vst [vmem:[%s268_s20] sm:$0x1] %v595_v11 }
  0xce PF: > { %s17_s21 = sadd.s32 1, %s883_s21  }
  0xcf   : > { %p14_p4 = scmp.ge.s32.totalorder %s17_s21, 4  }
  0xd1   :  { %16 = sbr.rel (!%p14_p4) target bundleno = 1 (0x1), region = 92 }

// kernel: up_forward.5
= control target key start
LH: loop header
LB: loop body
LE: loop exit
PB: predicated region body
PF: predicated region fallthrough
CT: control target
= control target key end

     0   :  { %s297_s12 = smov 0   ;;  %s314_s0 = inlined_call_operand.vmem [shape: f32[32,128], index: 0, kind: input, shape index: {}]   ;;  %s315_s1 = inlined_call_operand.vmem [shape: f32[1,128], index: 1, kind: input, shape index: {}]   ;;  %s316_s2 = inlined_call_operand.vmem [shape: f32[1,128], index: 2, kind: input, shape index: {}]   ;;  %s317_s3 = inlined_call_operand.vmem [shape: f32[32,128], index: 3, kind: output, shape index: {}]  }
   0x1 LB: > { %s248_s13 = sadd.s32 4294967295, %s275_s12   ;;  %p252_p0 = scmp.ge.s32.totalorder %s275_s12, 1  ;;  %s275_s12 = sphi %s297_s12, %s13_s12  }
   0x2   : > { %p138_p1 = scmp.lt.s32.totalorder %s275_s12, 3 }
   0x4   : > { %p139_p2 = pnand %p252_p0, %p138_p1 }
   0x5   : > { %s253_s14 = sshll.u32 (!%p139_p2), %s248_s13, 1 }
   0x6   : > { %142 = sbr.rel (%p139_p2) target bundleno = 23 (0x17), region = 32  ;;  %p163_p3 = scmp.lt.s32.totalorder (!%p139_p2), %s253_s14, 3 }
   0xb   : > { %s319_s14 = smov (!%p163_p3, %s253_s14), 3  ;;  %v267_v0 = vld [vmem:[%s315_s1] ss:$0 sm:$0xff] }
   0xc   : > { %s254_s17 = sshll.u32 %s319_s14, 3  ;;  %v268_v1 = vld [vmem:[%s316_s2] ss:$0 sm:$0xff] }
   0xd   : > { %s166_s20 = scalar_lea.vmem %s314_s0, %s254_s17  ;;  %s172_s25 = scalar_lea.vmem %s317_s3, %s254_s17 }
   0xe   : > { %v174_v2 = vld [vmem:[%s166_s20] sm:$0xff]  ;;  %v175_v3 = vld [vmem:[%s166_s20 + $0x8] sm:$0xff] }
   0xf   : > { %v180_v4 = vmul.f32 %v267_v0, %v174_v2  ;;  %v181_v5 = vmul.f32 %v267_v0, %v175_v3 }
  0x11   : > { %v186_v6 = vadd.f32 %v268_v1, %v180_v4  ;;  %v187_v7 = vadd.f32 %v268_v1, %v181_v5 }
  0x13   : > { %v188_v8 = vmax.f32 %v186_v6, 0.0  ;;  %v189_v9 = vmax.f32 %v187_v7, 0.0 }
  0x15   : > { %190 = vst [vmem:[%s172_s25] sm:$0xff] %v188_v8 }
  0x16   : > { %191 = vst [vmem:[%s172_s25 + $0x8] sm:$0xff] %v189_v9 }
  0x17 PF: > { %s13_s12 = sadd.s32 1, %s275_s12  }
  0x18   : > { %p10_p4 = scmp.ge.s32.totalorder %s13_s12, 4  }
  0x1a   :  { %12 = sbr.rel (!%p10_p4) target bundleno = 1 (0x1), region = 62 }

</bundles_post_ra>
